<compile_context>
chip_gen: v7x
topology: tpu7x:2x2x1
jax: 0.10.0
libtpu: 0.0.40
codegen_flags: <defaults>
</compile_context>

<pallas_src>
import math

import jax
import jax.numpy as jnp
from jax import lax
from jax.experimental import pallas as pl
from jax.experimental.pallas import tpu as pltpu

# ----------------------------- problem sizes --------------------------------
B = 2          # batch
C = 3          # image channels (RGB, like the detectron2 input)
H = W = 16     # spatial
HW = H * W
D = 32         # model / embedding dim
Q = 8          # detection queries
K = 16         # open-vocabulary text-embedding rows (zero-shot classifier)
NCLS = 10      # dataset classes used by the label-matching evaluator

HEAD = K + 4 + NCLS   # fused head width: class logits | box regression | cosine numerator

# Batch folding: each grid step processes IMGS_PER_STEP images folded onto the lane
# axis. Single-TC chips (v5e/v6e): fold everything -> grid=(1,) amortizes the
# ~0.35us/step overhead and widens every tile. On v7x (2 TensorCores) with larger
# batches, set IMGS_PER_STEP = B // 2 so each core takes one "parallel" grid step.
IMGS_PER_STEP = 2
assert B % IMGS_PER_STEP == 0
NSTEPS = B // IMGS_PER_STEP
LANES = IMGS_PER_STEP * HW           # folded pixel lanes per step (512)
ROWS = IMGS_PER_STEP * Q             # query rows produced per step (16)

# --------------------- fused parameter-slab layout [P_ROWS, 128] -------------
# rows 0..D-1 : lanes [0, HEAD)            wcat = [temb | wbox | cls_n]^T  ([D, HEAD])
#               lanes [HEAD, HEAD+C)       wp_eff  (stem weight, normalization folded in)
#               lane  HEAD+C               bp_eff  (stem bias,   normalization folded in)
# rows D..D+Q-1 : lanes [0,D)              qe * D**-0.5  (learned queries, scale folded)
# row  D+Q      : lanes [0,HEAD)           head bias (zeros | bbox | zeros)
WP_LANE = HEAD
BP_LANE = HEAD + C
QE_ROW = D
HBIAS_ROW = D + Q
P_ROWS = 48                           # padded to a multiple of 8 sublanes

# --------------------------- fused output layout ------------------------------
# One lane-dense f32 slab, one row per (image, query):
#   lanes [0,K)    sigmoid class scores
#   lanes [K,K+4)  sigmoid boxes (cx,cy,w,h in [0,1])
#   lane  K+4      best cosine-matching score
#   lane  K+5      matched dataset class id (stored as f32; exact for ids < 2^24)
MATCH_L = K + 4
CLSID_L = K + 5
OUT_LANES = 128


# ------------------------------ fused kernel ---------------------------------
def generateu_kernel(x_ref, p_ref, o_ref):
    # x_ref: [1, C, LANES]   IMGS_PER_STEP images, pixels folded onto lanes
    # p_ref: [P_ROWS, 128]   fused parameter slab (layout above)
    # o_ref: [ROWS, 128]     fused lane-dense output slab
    x = x_ref[0]                                            # [C, LANES]

    wcat = p_ref[0:D, 0:HEAD]                               # [D, HEAD], lane-0 aligned
    wp = p_ref[0:D, WP_LANE:WP_LANE + C]                    # [D, C]
    bp = p_ref[0:D, BP_LANE:BP_LANE + 1]                    # [D, 1]
    qe = p_ref[QE_ROW:QE_ROW + Q, 0:D]                      # [Q, D] (pre-scaled)
    hbias = p_ref[HBIAS_ROW:HBIAS_ROW + 1, 0:HEAD]          # [1, HEAD]

    # ---- backbone stem (1x1 conv; pixel normalization folded into wp/bp).
    #      K=C=3 contraction as 3 VPU rank-1 broadcast-FMAs instead of an MXU matmul.
    feats = bp + wp[:, 0:1] * x[0:1, :]                     # [D, LANES]
    for c in range(1, C):
        feats = feats + wp[:, c:c + 1] * x[c:c + 1, :]

    # ---- DETR-style cross-attention logits (1/sqrt(D) folded into qe on host) ----
    s_all = jnp.dot(qe, feats, preferred_element_type=jnp.float32)   # [Q, LANES]

    # ---- merged per-image softmax: per-segment max, ONE exp pass, deferred norm ----
    seg_max = [jnp.max(s_all[:, g * HW:(g + 1) * HW], axis=-1, keepdims=True)
               for g in range(IMGS_PER_STEP)]                         # each [Q, 1]
    m_bcast = jnp.concatenate(
        [jnp.broadcast_to(mg, (Q, HW)) for mg in seg_max], axis=-1)   # [Q, LANES]
    e_all = jnp.exp(s_all - m_bcast)                                  # single EUP pass
    denom = jnp.concatenate(
        [jnp.sum(e_all[:, g * HW:(g + 1) * HW], axis=-1, keepdims=True)
         for g in range(IMGS_PER_STEP)], axis=0)                      # [ROWS, 1]

    # ---- attention pooling: one hoisted transpose, natural-layout MXU matmuls ----
    feats_t = jnp.transpose(feats)                                    # [LANES, D]
    qf_un = jnp.concatenate(
        [jnp.dot(e_all[:, g * HW:(g + 1) * HW],
                 feats_t[g * HW:(g + 1) * HW, :],
                 preferred_element_type=jnp.float32)
         for g in range(IMGS_PER_STEP)], axis=0)                      # [ROWS, D]
    # Exact reciprocal (tiny [ROWS,1]) keeps the argmax class-id deterministic
    # vs. the pure-JAX reference (approx reciprocal could flip near-tied classes).
    qf = qf_un * pl.reciprocal(denom, approx=False)                   # [ROWS, D]

    # ---- fused heads: zero-shot logits | box regression | cosine numerator ----
    heads = jnp.dot(qf, wcat, preferred_element_type=jnp.float32) + hbias   # [ROWS, HEAD]
    # sigmoid via EUP tanh: sigmoid(x) = 0.5 * (tanh(0.5 x) + 1)
    sb = 0.5 * (jnp.tanh(0.5 * heads[:, 0:K + 4]) + 1.0)             # class scores | boxes
    inv_n = lax.rsqrt(jnp.sum(qf * qf, axis=-1, keepdims=True) + 1e-6)      # [ROWS, 1]
    sim = heads[:, K + 4:HEAD] * inv_n                               # cosine sim vs classes

    m = jnp.max(sim, axis=-1, keepdims=True)                         # [ROWS, 1]
    ids = lax.broadcasted_iota(jnp.int32, sim.shape, 1)
    clsid = jnp.min(jnp.where(sim >= m, ids, jnp.int32(2 ** 30)),
                    axis=-1, keepdims=True).astype(jnp.float32)      # [ROWS, 1]

    # ---- compose the output tile in vregs; ONE full-width unmasked store ----
    pad = jnp.zeros((ROWS, OUT_LANES - (CLSID_L + 1)), jnp.float32)
    o_ref[...] = jnp.concatenate([sb, m, clsid, pad], axis=-1)       # [ROWS, 128]


# ------------------------------- wrapper --------------------------------------
def _pack_params(params):
    """Fold pixel normalization + attention scale into the weights and fuse all
    parameters into a single zero-padded [P_ROWS, 128] f32 slab (one input DMA,
    static lane-0-aligned slices in-kernel)."""
    inv_std = 1.0 / params["std"][:, 0]                                     # [C]
    wp_eff = params["wp"] * inv_std[None, :]                                # [D, C]
    bp_eff = params["bp"][:, 0] - params["wp"] @ (params["mean"][:, 0] * inv_std)  # [D]

    cls = params["cls_emb"]
    cls_n = cls * lax.rsqrt(jnp.sum(cls * cls, axis=-1, keepdims=True) + 1e-6)
    wcat = jnp.concatenate([params["temb"], params["wbox"].T, cls_n], axis=0).T  # [D, HEAD]

    slab = jnp.zeros((P_ROWS, 128), jnp.float32)
    slab = slab.at[0:D, 0:HEAD].set(wcat)
    slab = slab.at[0:D, WP_LANE:WP_LANE + C].set(wp_eff)
    slab = slab.at[0:D, BP_LANE].set(bp_eff)
    slab = slab.at[QE_ROW:QE_ROW + Q, 0:D].set(params["qe"] * (D ** -0.5))
    slab = slab.at[HBIAS_ROW, K:K + 4].set(params["bbox"][0])
    return slab


def generateu_forward(x, params):
    """x: [B, C, H, W] float32 image batch (NCHW, like the PyTorch module)."""
    slab = _pack_params(params)
    # fold IMGS_PER_STEP images onto the lane axis: [NSTEPS, C, IMGS_PER_STEP*HW]
    x_steps = (x.reshape(NSTEPS, IMGS_PER_STEP, C, HW)
                .transpose(0, 2, 1, 3)
                .reshape(NSTEPS, C, LANES))

    out = pl.pallas_call(
        generateu_kernel,
        out_shape=jax.ShapeDtypeStruct((B * Q, OUT_LANES), jnp.float32),
        grid_spec=pltpu.PrefetchScalarGridSpec(
            num_scalar_prefetch=0,
            grid=(NSTEPS,),
            in_specs=[
                pl.BlockSpec((1, C, LANES), lambda i: (i, 0, 0)),   # folded images
                pl.BlockSpec((P_ROWS, 128), lambda i: (0, 0)),      # fused param slab
            ],
            out_specs=pl.BlockSpec((ROWS, OUT_LANES), lambda i: (i, 0)),
        ),
        compiler_params=pltpu.CompilerParams(dimension_semantics=("parallel",)),
    )(x_steps, slab)

    out = out.reshape(B, Q, OUT_LANES)
    scores = out[..., 0:K]
    boxes = out[..., K:K + 4]
    match = out[..., MATCH_L:MATCH_L + 1]
    clsid = out[..., CLSID_L:CLSID_L + 1].astype(jnp.int32)
    return scores, boxes, clsid, match


# --------------------------- pure-JAX reference --------------------------------
def generateu_reference(x, params):
    x_flat = x.reshape(B, C, HW)
    xn = (x_flat - params["mean"][None]) / params["std"][None]
    feats = jnp.einsum("dc,bcn->bdn", params["wp"], xn) + params["bp"][None]
    s = jnp.einsum("qd,bdn->bqn", params["qe"], feats) / math.sqrt(D)
    p = jax.nn.softmax(s, axis=-1)
    qf = jnp.einsum("bqn,bdn->bqd", p, feats)
    scores = jax.nn.sigmoid(jnp.einsum("bqd,kd->bqk", qf, params["temb"]))
    boxes = jax.nn.sigmoid(jnp.einsum("bqd,df->bqf", qf, params["wbox"]) + params["bbox"][None])
    qf_n = qf / jnp.sqrt(jnp.sum(qf * qf, -1, keepdims=True) + 1e-6)
    cls_n = params["cls_emb"] / jnp.sqrt(
        jnp.sum(params["cls_emb"] ** 2, -1, keepdims=True) + 1e-6
    )
    sim = jnp.einsum("bqd,cd->bqc", qf_n, cls_n)
    ids = jnp.argmax(sim, axis=-1)[..., None].astype(jnp.int32)
    mscore = jnp.max(sim, axis=-1, keepdims=True)
    return scores, boxes, ids, mscore


# ----------------------------------- main --------------------------------------
if __name__ == "__main__":
    # TODO(synk): detectron2 model build / DetectionCheckpointer load, ResizeShortestEdge
    # resampling, text-description generation and Instances/NMS bookkeeping have no clean
    # Pallas equivalent; weights are synthetic.
    key = jax.random.PRNGKey(0)
    keys = jax.random.split(key, 10)

    x = jax.random.uniform(keys[0], (B, C, H, W), jnp.float32) * 255.0

    params = {
        "mean": jnp.array([[123.675], [116.28], [103.53]], jnp.float32),   # [C,1]
        "std":  jnp.array([[58.395], [57.12], [57.375]], jnp.float32),     # [C,1]
        "wp":   jax.random.normal(keys[1], (D, C), jnp.float32) * 0.1,
        "bp":   jax.random.normal(keys[2], (D, 1), jnp.float32) * 0.01,
        "qe":   jax.random.normal(keys[3], (Q, D), jnp.float32) * 0.1,
        "temb": jax.random.normal(keys[4], (K, D), jnp.float32) * 0.1,
        "wbox": jax.random.normal(keys[5], (D, 4), jnp.float32) * 0.1,
        "bbox": jax.random.normal(keys[6], (1, 4), jnp.float32) * 0.01,
        "cls_emb": jax.random.normal(keys[7], (NCLS, D), jnp.float32) * 0.1,
    }

    outs = generateu_forward(x, params)
    outs = jax.block_until_ready(outs)

    refs = generateu_reference(x, params)
    names = ("scores", "boxes", "class_ids", "match_scores")
    # 1e-3 tolerance: host-side folding of normalization / attention scale and the
    # tanh-form sigmoid reassociate a few fp ops; differences stay far below 1e-3.
    for name, o, r in zip(names, outs, refs):
        assert o.shape == r.shape, (name, o.shape, r.shape)
        if o.dtype == jnp.int32:
            assert bool(jnp.all(o == r)), f"mismatch in {name}"
        else:
            assert bool(
                jnp.allclose(o, r, rtol=1e-3, atol=1e-3)
            ), f"mismatch in {name}"

    print("KERNEL_OK")
</pallas_src>

<mosaic_0001>
module attributes {stable_mosaic.version = 11 : i64} {
  func.func @generateu_kernel(%arg0: i32, %arg1: memref<1x3x512xf32, #tpu.memory_space<vmem>>, %arg2: memref<48x128xf32, #tpu.memory_space<vmem>>, %arg3: memref<16x128xf32, #tpu.memory_space<vmem>>) attributes {dimension_semantics = [#tpu.dimension_semantics<parallel>], iteration_bounds = array<i64: 1>, scalar_prefetch = 0 : i64, scratch_operands = 0 : i64, tpu.core_type = #tpu.core_type<tc>, window_params = [{transform_indices = @transform_0, window_bounds = array<i64: 1, 3, 512>}, {pipeline_mode = #tpu.pipeline_mode<synchronous>, transform_indices = @transform_1, window_bounds = array<i64: 48, 128>}, {transform_indices = @transform_2, window_bounds = array<i64: 16, 128>}]} {
    %c0 = arith.constant 0 : index
    %c0_0 = arith.constant 0 : index
    %c0_1 = arith.constant 0 : index
    %0 = vector.load %arg1[%c0, %c0_0, %c0_1] : memref<1x3x512xf32, #tpu.memory_space<vmem>>, vector<1x3x512xf32>
    %1 = vector.shape_cast %0 : vector<1x3x512xf32> to vector<3x512xf32>
    %c0_2 = arith.constant 0 : index
    %c0_3 = arith.constant 0 : index
    %2 = vector.load %arg2[%c0_2, %c0_3] : memref<48x128xf32, #tpu.memory_space<vmem>>, vector<32x30xf32>
    %c0_4 = arith.constant 0 : index
    %c30 = arith.constant 30 : index
    %3 = vector.load %arg2[%c0_4, %c30] : memref<48x128xf32, #tpu.memory_space<vmem>>, vector<32x3xf32>
    %c0_5 = arith.constant 0 : index
    %c33 = arith.constant 33 : index
    %4 = vector.load %arg2[%c0_5, %c33] : memref<48x128xf32, #tpu.memory_space<vmem>>, vector<32x1xf32>
    %c32 = arith.constant 32 : index
    %c0_6 = arith.constant 0 : index
    %5 = vector.load %arg2[%c32, %c0_6] : memref<48x128xf32, #tpu.memory_space<vmem>>, vector<8x32xf32>
    %c40 = arith.constant 40 : index
    %c0_7 = arith.constant 0 : index
    %6 = vector.load %arg2[%c40, %c0_7] : memref<48x128xf32, #tpu.memory_space<vmem>>, vector<1x30xf32>
    %7 = vector.extract_strided_slice %3 {offsets = [0, 0], sizes = [32, 1], strides = [1, 1]} : vector<32x3xf32> to vector<32x1xf32>
    %8 = vector.extract_strided_slice %1 {offsets = [0, 0], sizes = [1, 512], strides = [1, 1]} : vector<3x512xf32> to vector<1x512xf32>
    %9 = vector.broadcast %7 : vector<32x1xf32> to vector<32x512xf32>
    %10 = vector.broadcast %8 : vector<1x512xf32> to vector<32x512xf32>
    %11 = arith.mulf %9, %10 : vector<32x512xf32>
    %12 = vector.broadcast %4 : vector<32x1xf32> to vector<32x512xf32>
    %13 = arith.addf %12, %11 : vector<32x512xf32>
    %14 = vector.extract_strided_slice %3 {offsets = [0, 1], sizes = [32, 1], strides = [1, 1]} : vector<32x3xf32> to vector<32x1xf32>
    %15 = vector.extract_strided_slice %1 {offsets = [1, 0], sizes = [1, 512], strides = [1, 1]} : vector<3x512xf32> to vector<1x512xf32>
    %16 = vector.broadcast %14 : vector<32x1xf32> to vector<32x512xf32>
    %17 = vector.broadcast %15 : vector<1x512xf32> to vector<32x512xf32>
    %18 = arith.mulf %16, %17 : vector<32x512xf32>
    %19 = arith.addf %13, %18 : vector<32x512xf32>
    %20 = vector.extract_strided_slice %3 {offsets = [0, 2], sizes = [32, 1], strides = [1, 1]} : vector<32x3xf32> to vector<32x1xf32>
    %21 = vector.extract_strided_slice %1 {offsets = [2, 0], sizes = [1, 512], strides = [1, 1]} : vector<3x512xf32> to vector<1x512xf32>
    %22 = vector.broadcast %20 : vector<32x1xf32> to vector<32x512xf32>
    %23 = vector.broadcast %21 : vector<1x512xf32> to vector<32x512xf32>
    %24 = arith.mulf %22, %23 : vector<32x512xf32>
    %25 = arith.addf %19, %24 : vector<32x512xf32>
    %cst = arith.constant dense<0.000000e+00> : vector<8x512xf32>
    %26 = tpu.matmul %5, %25, %cst {dimension_numbers = #tpu.dot_dimension_numbers<[1], [0], [0], [1], [0, 0, 1, 1], [], []>} : vector<8x32xf32>, vector<32x512xf32>, vector<8x512xf32> -> vector<8x512xf32>
    %27 = vector.extract_strided_slice %26 {offsets = [0, 0], sizes = [8, 256], strides = [1, 1]} : vector<8x512xf32> to vector<8x256xf32>
    %cst_8 = arith.constant dense<0xFF800000> : vector<8xf32>
    %28 = vector.multi_reduction <maximumf>, %27, %cst_8 [1] : vector<8x256xf32> to vector<8xf32>
    %29 = vector.shape_cast %28 : vector<8xf32> to vector<8x1xf32>
    %30 = vector.extract_strided_slice %26 {offsets = [0, 256], sizes = [8, 256], strides = [1, 1]} : vector<8x512xf32> to vector<8x256xf32>
    %cst_9 = arith.constant dense<0xFF800000> : vector<8xf32>
    %31 = vector.multi_reduction <maximumf>, %30, %cst_9 [1] : vector<8x256xf32> to vector<8xf32>
    %32 = vector.shape_cast %31 : vector<8xf32> to vector<8x1xf32>
    %33 = vector.shape_cast %29 : vector<8x1xf32> to vector<8x1xf32>
    %34 = vector.broadcast %33 : vector<8x1xf32> to vector<8x256xf32>
    %35 = vector.shape_cast %32 : vector<8x1xf32> to vector<8x1xf32>
    %36 = vector.broadcast %35 : vector<8x1xf32> to vector<8x256xf32>
    %37 = tpu.concatenate %34, %36 in 1 : vector<8x256xf32>, vector<8x256xf32> -> vector<8x512xf32>
    %38 = arith.subf %26, %37 : vector<8x512xf32>
    %39 = math.exp %38 : vector<8x512xf32>
    %40 = vector.extract_strided_slice %39 {offsets = [0, 0], sizes = [8, 256], strides = [1, 1]} : vector<8x512xf32> to vector<8x256xf32>
    %cst_10 = arith.constant dense<0.000000e+00> : vector<8xf32>
    %41 = vector.multi_reduction <add>, %40, %cst_10 [1] : vector<8x256xf32> to vector<8xf32>
    %42 = vector.shape_cast %41 : vector<8xf32> to vector<8x1xf32>
    %43 = vector.extract_strided_slice %39 {offsets = [0, 256], sizes = [8, 256], strides = [1, 1]} : vector<8x512xf32> to vector<8x256xf32>
    %cst_11 = arith.constant dense<0.000000e+00> : vector<8xf32>
    %44 = vector.multi_reduction <add>, %43, %cst_11 [1] : vector<8x256xf32> to vector<8xf32>
    %45 = vector.shape_cast %44 : vector<8xf32> to vector<8x1xf32>
    %46 = tpu.concatenate %42, %45 in 0 : vector<8x1xf32>, vector<8x1xf32> -> vector<16x1xf32>
    %47 = tpu.transpose %25, [1, 0] : vector<32x512xf32> -> vector<512x32xf32>
    %48 = vector.extract_strided_slice %39 {offsets = [0, 0], sizes = [8, 256], strides = [1, 1]} : vector<8x512xf32> to vector<8x256xf32>
    %49 = vector.extract_strided_slice %47 {offsets = [0, 0], sizes = [256, 32], strides = [1, 1]} : vector<512x32xf32> to vector<256x32xf32>
    %cst_12 = arith.constant dense<0.000000e+00> : vector<8x32xf32>
    %50 = tpu.matmul %48, %49, %cst_12 {dimension_numbers = #tpu.dot_dimension_numbers<[1], [0], [0], [1], [0, 0, 1, 1], [], []>} : vector<8x256xf32>, vector<256x32xf32>, vector<8x32xf32> -> vector<8x32xf32>
    %51 = vector.extract_strided_slice %39 {offsets = [0, 256], sizes = [8, 256], strides = [1, 1]} : vector<8x512xf32> to vector<8x256xf32>
    %52 = vector.extract_strided_slice %47 {offsets = [256, 0], sizes = [256, 32], strides = [1, 1]} : vector<512x32xf32> to vector<256x32xf32>
    %cst_13 = arith.constant dense<0.000000e+00> : vector<8x32xf32>
    %53 = tpu.matmul %51, %52, %cst_13 {dimension_numbers = #tpu.dot_dimension_numbers<[1], [0], [0], [1], [0, 0, 1, 1], [], []>} : vector<8x256xf32>, vector<256x32xf32>, vector<8x32xf32> -> vector<8x32xf32>
    %54 = tpu.concatenate %50, %53 in 0 : vector<8x32xf32>, vector<8x32xf32> -> vector<16x32xf32>
    %55 = tpu.reciprocal %46 : vector<16x1xf32> -> vector<16x1xf32>
    %56 = vector.broadcast %55 : vector<16x1xf32> to vector<16x32xf32>
    %57 = arith.mulf %54, %56 : vector<16x32xf32>
    %cst_14 = arith.constant dense<0.000000e+00> : vector<16x30xf32>
    %58 = tpu.matmul %57, %2, %cst_14 {dimension_numbers = #tpu.dot_dimension_numbers<[1], [0], [0], [1], [0, 0, 1, 1], [], []>} : vector<16x32xf32>, vector<32x30xf32>, vector<16x30xf32> -> vector<16x30xf32>
    %59 = vector.broadcast %6 : vector<1x30xf32> to vector<16x30xf32>
    %60 = arith.addf %58, %59 : vector<16x30xf32>
    %61 = vector.extract_strided_slice %60 {offsets = [0, 0], sizes = [16, 20], strides = [1, 1]} : vector<16x30xf32> to vector<16x20xf32>
    %cst_15 = arith.constant 5.000000e-01 : f32
    %62 = vector.broadcast %cst_15 : f32 to vector<16x20xf32>
    %63 = arith.mulf %62, %61 : vector<16x20xf32>
    %64 = math.tanh %63 : vector<16x20xf32>
    %cst_16 = arith.constant 1.000000e+00 : f32
    %65 = vector.broadcast %cst_16 : f32 to vector<16x20xf32>
    %66 = arith.addf %64, %65 : vector<16x20xf32>
    %cst_17 = arith.constant 5.000000e-01 : f32
    %67 = vector.broadcast %cst_17 : f32 to vector<16x20xf32>
    %68 = arith.mulf %67, %66 : vector<16x20xf32>
    %69 = arith.mulf %57, %57 : vector<16x32xf32>
    %cst_18 = arith.constant dense<0.000000e+00> : vector<16xf32>
    %70 = vector.multi_reduction <add>, %69, %cst_18 [1] : vector<16x32xf32> to vector<16xf32>
    %71 = vector.shape_cast %70 : vector<16xf32> to vector<16x1xf32>
    %cst_19 = arith.constant 9.99999997E-7 : f32
    %72 = vector.broadcast %cst_19 : f32 to vector<16x1xf32>
    %73 = arith.addf %71, %72 : vector<16x1xf32>
    %74 = math.rsqrt %73 : vector<16x1xf32>
    %75 = vector.extract_strided_slice %60 {offsets = [0, 20], sizes = [16, 10], strides = [1, 1]} : vector<16x30xf32> to vector<16x10xf32>
    %76 = vector.broadcast %74 : vector<16x1xf32> to vector<16x10xf32>
    %77 = arith.mulf %75, %76 : vector<16x10xf32>
    %cst_20 = arith.constant dense<0xFF800000> : vector<16xf32>
    %78 = vector.multi_reduction <maximumf>, %77, %cst_20 [1] : vector<16x10xf32> to vector<16xf32>
    %79 = vector.shape_cast %78 : vector<16xf32> to vector<16x1xf32>
    %80 = tpu.iota {dimensions = array<i32: 1>} : vector<16x10xi32>
    %81 = vector.broadcast %79 : vector<16x1xf32> to vector<16x10xf32>
    %82 = arith.cmpf oge, %77, %81 : vector<16x10xf32>
    %c1073741824_i32 = arith.constant 1073741824 : i32
    %83 = vector.broadcast %c1073741824_i32 : i32 to vector<16x10xi32>
    %84 = arith.select %82, %80, %83 : vector<16x10xi1>, vector<16x10xi32>
    %cst_21 = arith.constant dense<2147483647> : vector<16xi32>
    %85 = vector.multi_reduction <minsi>, %84, %cst_21 [1] : vector<16x10xi32> to vector<16xi32>
    %86 = vector.shape_cast %85 : vector<16xi32> to vector<16x1xi32>
    %87 = arith.sitofp %86 : vector<16x1xi32> to vector<16x1xf32>
    %cst_22 = arith.constant 0.000000e+00 : f32
    %88 = vector.broadcast %cst_22 : f32 to vector<16x106xf32>
    %89 = tpu.concatenate %68, %79, %87, %88 in 1 : vector<16x20xf32>, vector<16x1xf32>, vector<16x1xf32>, vector<16x106xf32> -> vector<16x128xf32>
    %c0_23 = arith.constant 0 : index
    %c0_24 = arith.constant 0 : index
    %90 = vector.load %arg3[%c0_23, %c0_24] : memref<16x128xf32, #tpu.memory_space<vmem>>, vector<16x128xf32>
    tpu.vector_store %arg3[%c0_23, %c0_24], %89 {strides = array<i32>} : memref<16x128xf32, #tpu.memory_space<vmem>>, vector<16x128xf32>,
    return
  }
  func.func @transform_0(%arg0: i32) -> (i32, i32, i32) {
    %c0_i32 = arith.constant 0 : i32
    %c0_i32_0 = arith.constant 0 : i32
    %c0_i32_1 = arith.constant 0 : i32
    return %arg0, %c0_i32, %c0_i32_0 : i32, i32, i32
  }
  func.func @transform_1(%arg0: i32) -> (i32, i32) {
    %c0_i32 = arith.constant 0 : i32
    %c0_i32_0 = arith.constant 0 : i32
    %c0_i32_1 = arith.constant 0 : i32
    return %c0_i32, %c0_i32_0 : i32, i32
  }
  func.func @transform_2(%arg0: i32) -> (i32, i32) {
    %c0_i32 = arith.constant 0 : i32
    %c0_i32_0 = arith.constant 0 : i32
    return %arg0, %c0_i32 : i32, i32
  }
}

</mosaic_0001>

<bundles_post_ra>
// kernel: tpu_custom_call.1
= control target key start
LH: loop header
LB: loop body
LE: loop exit
PB: predicated region body
PF: predicated region fallthrough
CT: control target
= control target key end

     0   :  { %7 = vsyncpa [#allocation3], 0  ;;  %s1175_s0 = inlined_call_operand.vmem [shape: f32[1,3,512], index: 0, kind: input, shape index: {}]   ;;  %s1176_s1 = inlined_call_operand.hbm [shape: f32[48,128], index: 1, kind: input, shape index: {}]   ;;  %s1177_s2 = inlined_call_operand.hbm [shape: f32[16,128], index: 2, kind: output, shape index: {}]  }
   0x1   :  { %8 = vsyncpa [#allocation4], 0  ;;  %s967_s9 = smov [#allocation2]   ;;  %s919_s13 = scalar_lea.hbm %s1176_s1, 768 }
   0x2   :  { %s16_s10 = sshll.u32 %s967_s9, 4  ;;  %p920_p0 = scmp.ne.s32.totalorder %s1176_s1, %s919_s13  ;;  %s17_s10 = int_to_ptr.vmem [resolvable:$true] %s16_s10 }
   0x3   :  { %p923_p1 = scmp.lt.u32.totalorder %s919_s13, %s1176_s1 }
   0x5   :  { %p925_p2 = pnand %p923_p1, %p920_p0 }
   0x7   :  { %928 = shalt.err (!%p925_p2)
}
   0x8   :  { %s929_s18 = scalar_lea.vmem %s17_s10, 768  ;;  %p934_p4 = scmp.lt.s32.totalorder %s17_s10, %s17_s10 }
   0x9   :  { %p930_p3 = scmp.ne.s32.totalorder %s17_s10, %s929_s18  ;;  %p935_p5 = scmp.lt.s32.totalorder %s929_s18, %s929_s18 }
   0xb   :  { %p936_p6 = por %p935_p5, %p934_p4 }
   0xd   :  { %p937_p7 = pnand %p936_p6, %p930_p3 }
   0xf   :  { %940 = shalt.err (!%p937_p7)
}
  0x10   :  { %s968_s19 = smov 128   ;;  %s969_s20 = smov 8  }
  0x11   :  { %22 = dma.hbm_to_vmem [thread:$0]  %s1176_s1, 768, %s17_s10, [#allocation3], %s968_s19, %s968_s19, %s969_s20  }
  0x12   :  { %963 = dma.done.wait [#allocation3], 768  }
  0x13   :  { %964 = vsyncadd [#allocation3], 4294966528  ;;  %v970_v0 = vmov 33   ;;  %v971_v1 = vmov 30   ;;  %v1008_v2 = vld [vmem:[#allocation2] sm:$0xff]  ;;  %v1012_v3 = vld [vmem:[#allocation2 + $0x8] sm:$0xff]  ;;  %v56_v9 = vlaneseq }
  0x14   :  { %888 = vset.pattern.permute.xlu1 %v970_v0  ;;  %887 = vset.pattern.permute.xlu0 %v971_v1  ;;  %v1016_v4 = vld [vmem:[#allocation2 + $0x18] sm:$0xff]  ;;  %v972_v5 = vmov 31   ;;  %v1020_v6 = vld [vmem:[#allocation2 + $0x10] sm:$0xff]  ;;  %v973_v7 = vmov 32   ;;  %v974_v8 = vmov 0.0   ;;  %vm308_vm0 = vcmask 261120  }
  0x15   :  { %109 = vperm.xlu1 %888, %v1008_v2   ;;  %36 = vperm.xlu0 %887, %v1008_v2   ;;  %v57_v10 = vshrl.u32 %v56_v9, 7  ;;  %v26_v15 = vld [vmem:[%s1175_s0] sm:$0x77]  ;;  %v27_v16 = vld [vmem:[%s1175_s0 + $0x8] sm:$0x77]  ;;  %vm739_vm1 = vcmask 244896  }
  0x16   :  { %376 = vmatprep.mubr.f32.mxu0 %v974_v8  ;;  %447 = vmatprep.mubr.f32.mxu1 %v974_v8  ;;  %s976_s0 = smov 20   ;;  %vm786_vm2 = vcmask 162816   ;;  %vm789_vm7 = vcmask 171008   ;;  %vm792_vm8 = vcmask 179200   ;;  %s977_s26 = smov [#allocation5]  }
  0x17   :  { %v58_v13 = vsub.s32 0, %v57_v10  ;;  %v62_v14 = vsub.s32 4, %v57_v10  ;;  %v158_v23 = vsub.s32 1, %v57_v10  ;;  %v162_v24 = vsub.s32 5, %v57_v10  ;;  %s802_s27 = sshll.u32 %s977_s26, 4  ;;  %s803_s27 = int_to_ptr.vmem [resolvable:$true] %s802_s27 }
  0x18   :  { %v246_v26 = vsub.s32 6, %v57_v10  ;;  %v242_v28 = vsub.s32 2, %v57_v10  ;;  %s941_s28 = scalar_lea.vmem %s803_s27, 256  ;;  %p946_p9 = scmp.lt.s32.totalorder %s803_s27, %s803_s27 }
  0x19   :  { %113 = vperm.xlu1 %888, %v1012_v3   ;;  %41 = vperm.xlu0 %887, %v1012_v3   ;;  %v59_v19 = vrot.slane %v26_v15, %v58_v13  ;;  %v63_v20 = vrot.slane %v26_v15, %v62_v14  ;;  %v67_v21 = vrot.slane %v27_v16, %v58_v13  ;;  %p942_p8 = scmp.ne.s32.totalorder %s803_s27, %s941_s28  ;;  %p947_p10 = scmp.lt.s32.totalorder %s941_s28, %s941_s28 }
  0x1a   :  { %v71_v22 = vrot.slane %v27_v16, %v62_v14  ;;  %v159_v33 = vrot.slane %v26_v15, %v158_v23  ;;  %v163_v34 = vrot.slane %v26_v15, %v162_v24  ;;  %v167_v35 = vrot.slane %v27_v16, %v158_v23 }
  0x1b   :  { %v1041_v29 = vrot.slane %v59_v19, %v58_v13  ;;  %v1043_v30 = vrot.slane %v63_v20, %v58_v13  ;;  %v1045_v31 = vrot.slane %v67_v21, %v58_v13  ;;  %v171_v36 = vrot.slane %v27_v16, %v162_v24  ;;  %p948_p11 = por %p947_p10, %p946_p9 }
  0x1c   :  { %v1047_v32 = vrot.slane %v71_v22, %v58_v13  ;;  %v247_v37 = vrot.slane %v26_v15, %v246_v26  ;;  %v255_v38 = vrot.slane %v27_v16, %v246_v26  ;;  %v243_v40 = vrot.slane %v26_v15, %v242_v28 }
  0x1d   :  { %889 = vset.pattern.permute.xlu1 %v972_v5  ;;  %51 = vperm.xlu0 %887, %v1016_v4   ;;  %v251_v41 = vrot.slane %v27_v16, %v242_v28  ;;  %v1057_v47 = vrot.slane %v159_v33, %v158_v23  ;;  %v1059_v48 = vrot.slane %v163_v34, %v158_v23  ;;  %p949_p12 = pnand %p948_p11, %p942_p8 }
  0x1e   :  { %145 = vperm.xlu1 %889, %v1012_v3   ;;  %v1061_v49 = vrot.slane %v167_v35, %v158_v23  ;;  %v1063_v50 = vrot.slane %v171_v36, %v158_v23  ;;  %v1067_v53 = vrot.slane %v247_v37, %v242_v28  ;;  %v1069_v54 = vrot.slane %v255_v38, %v242_v28 }
  0x1f   :  { %v1073_v57 = vrot.slane %v243_v40, %v242_v28  ;;  %v1075_v58 = vrot.slane %v251_v41, %v242_v28 }
  0x21   :  { %892 = vset.pattern.permute.xlu0 %v970_v0 }
  0x22   :  { %890 = vset.pattern.permute.xlu1 %v971_v1  ;;  %117 = vperm.xlu0 %892, %v1020_v6  }
  0x23   :  { %46 = vperm.xlu1 %890, %v1020_v6  }
  0x26   :  { %893 = vset.pattern.permute.xlu0 %v972_v5 }
  0x27   :  { %891 = vset.pattern.permute.xlu1 %v973_v7  ;;  %141 = vperm.xlu0 %893, %v1008_v2  }
  0x28   :  { %225 = vperm.xlu1 %891, %v1008_v2  }
  0x2b   :  { %153 = vperm.xlu0 %893, %v1016_v4  }
  0x2c   :  { %229 = vperm.xlu1 %891, %v1012_v3  }
  0x30   :  { %894 = vset.pattern.permute.xlu1 %v970_v0 }
  0x31   :  { %121 = vperm.xlu1 %894, %v1016_v4  }
  0x35   :  { %895 = vset.pattern.permute.xlu1 %v972_v5 }
  0x36   :  { %149 = vperm.xlu1 %895, %v1020_v6  }
  0x3a   :  { %896 = vset.pattern.permute.xlu1 %v973_v7 }
  0x3b   :  { %233 = vperm.xlu1 %896, %v1020_v6  }
  0x3f   :  { %237 = vperm.xlu1 %896, %v1016_v4  }
  0x94   :  { %v110_v11 = vpop.permute.xlu1 %109  ;;  %v37_v12 = vpop.permute.xlu0 %36 }
  0x95   :  { %v92_v42 = vmul.f32 %v1041_v29, %v37_v12  ;;  %v93_v43 = vmul.f32 %v1043_v30, %v37_v12  ;;  %v94_v44 = vmul.f32 %v1045_v31, %v37_v12  ;;  %v95_v45 = vmul.f32 %v1047_v32, %v37_v12 }
  0x97   :  { %v125_v60 = vadd.f32 %v110_v11, %v93_v43  ;;  %v127_v61 = vadd.f32 %v110_v11, %v95_v45  ;;  %v124_v62 = vadd.f32 %v110_v11, %v92_v42  ;;  %v126_v63 = vadd.f32 %v110_v11, %v94_v44 }
  0x98   :  { %v114_v17 = vpop.permute.xlu1 %113  ;;  %v42_v18 = vpop.permute.xlu0 %41 }
  0x99   :  { %v97_v51 = vmul.f32 %v1043_v30, %v42_v18  ;;  %v99_v52 = vmul.f32 %v1047_v32, %v42_v18  ;;  %v96_v55 = vmul.f32 %v1041_v29, %v42_v18  ;;  %v98_v56 = vmul.f32 %v1045_v31, %v42_v18 }
  0x9b   :  { %v129_v13 = vadd.f32 %v114_v17, %v97_v51  ;;  %v131_v14 = vadd.f32 %v114_v17, %v99_v52  ;;  %v128_v11 = vadd.f32 %v114_v17, %v96_v55  ;;  %v130_v18 = vadd.f32 %v114_v17, %v98_v56 }
  0x9c   :  { %v1039_v25 = vpop.permute.xlu0 %51 }
  0x9d   :  { %v146_v27 = vpop.permute.xlu1 %145 }
  0x9e   :  { %v197_v0 = vmul.f32 %v1059_v48, %v146_v27  ;;  %v199_v1 = vmul.f32 %v1063_v50, %v146_v27  ;;  %v196_v15 = vmul.f32 %v1057_v47, %v146_v27  ;;  %v198_v16 = vmul.f32 %v1061_v49, %v146_v27 }
  0xa0   :  { %v213_v24 = vadd.f32 %v197_v0, %v129_v13  ;;  %v215_v26 = vadd.f32 %v199_v1, %v131_v14  ;;  %v212_v17 = vadd.f32 %v196_v15, %v128_v11  ;;  %v214_v38 = vadd.f32 %v198_v16, %v130_v18 }
  0xa1   :  { %v1049_v39 = vpop.permute.xlu0 %117  ;;  %v104_v1 = vmul.f32 %v1041_v29, %v1039_v25 }
  0xa2   :  { %v1055_v46 = vpop.permute.xlu1 %46 }
  0xa3   :  { %v102_v13 = vmul.f32 %v1045_v31, %v1055_v46  ;;  %v103_v14 = vmul.f32 %v1047_v32, %v1055_v46 }
  0xa6   :  { %v142_v59 = vpop.permute.xlu0 %141 }
  0xa7   :  { %v193_v5 = vmul.f32 %v1059_v48, %v142_v59  ;;  %v195_v7 = vmul.f32 %v1063_v50, %v142_v59  ;;  %v226_v8 = vpop.permute.xlu1 %225  ;;  %v192_v10 = vmul.f32 %v1057_v47, %v142_v59  ;;  %v194_v12 = vmul.f32 %v1061_v49, %v142_v59 }
  0xa8   :  { %v277_v20 = vmul.f32 %v1067_v53, %v226_v8  ;;  %v279_v22 = vmul.f32 %v1069_v54, %v226_v8  ;;  %v276_v28 = vmul.f32 %v1073_v57, %v226_v8  ;;  %v278_v33 = vmul.f32 %v1075_v58, %v226_v8 }
  0xa9   :  { %v209_v19 = vadd.f32 %v193_v5, %v125_v60  ;;  %v211_v21 = vadd.f32 %v195_v7, %v127_v61  ;;  %v208_v27 = vadd.f32 %v192_v10, %v124_v62  ;;  %v210_v36 = vadd.f32 %v194_v12, %v126_v63 }
  0xaa   :  { %v154_v63 = vpop.permute.xlu0 %153  ;;  %v105_v5 = vmul.f32 %v1043_v30, %v1039_v25  ;;  %v106_v7 = vmul.f32 %v1045_v31, %v1039_v25  ;;  %v107_v8 = vmul.f32 %v1047_v32, %v1039_v25  ;;  %v100_v10 = vmul.f32 %v1041_v29, %v1055_v46 }
  0xab   :  { %v230_v23 = vpop.permute.xlu1 %229  ;;  %v293_v41 = vadd.f32 %v277_v20, %v209_v19  ;;  %v295_v43 = vadd.f32 %v279_v22, %v211_v21  ;;  %v292_v59 = vadd.f32 %v276_v28, %v208_v27  ;;  %v294_v60 = vadd.f32 %v278_v33, %v210_v36 }
  0xac   :  { %v281_v34 = vmul.f32 %v1067_v53, %v230_v23  ;;  %v283_v35 = vmul.f32 %v1069_v54, %v230_v23  ;;  %v280_v37 = vmul.f32 %v1073_v57, %v230_v23  ;;  %v282_v40 = vmul.f32 %v1075_v58, %v230_v23 }
  0xad   :  { %v101_v12 = vmul.f32 %v1043_v30, %v1055_v46  ;;  %v204_v15 = vmul.f32 %v1057_v47, %v154_v63  ;;  %v205_v16 = vmul.f32 %v1059_v48, %v154_v63  ;;  %v206_v11 = vmul.f32 %v1061_v49, %v154_v63 }
  0xae   :  { %v297_v42 = vadd.f32 %v281_v34, %v213_v24  ;;  %v299_v44 = vadd.f32 %v283_v35, %v215_v26  ;;  %v296_v45 = vadd.f32 %v280_v37, %v212_v17  ;;  %v298_v51 = vadd.f32 %v282_v40, %v214_v38 }
  0xaf   :  { %v207_v25 = vmul.f32 %v1063_v50, %v154_v63  ;;  %v132_v22 = vadd.f32 %v1049_v39, %v100_v10  ;;  %v133_v23 = vadd.f32 %v1049_v39, %v101_v12  ;;  %v134_v24 = vadd.f32 %v1049_v39, %v102_v13 }
  0xb0   :  { %v122_v52 = vpop.permute.xlu1 %121  ;;  %v1093_v55 = vpack.c.bf16 %v297_v42, %v293_v41  ;;  %v1095_v56 = vpack.c.bf16 %v299_v44, %v295_v43  ;;  %v1099_v61 = vpack.c.bf16 %v296_v45, %v292_v59  ;;  %v1101_v62 = vpack.c.bf16 %v298_v51, %v294_v60 }
  0xb1   :  { %v136_v18 = vadd.f32 %v122_v52, %v104_v1  ;;  %v137_v19 = vadd.f32 %v122_v52, %v105_v5  ;;  %v138_v29 = vadd.f32 %v122_v52, %v106_v7  ;;  %v139_v20 = vadd.f32 %v122_v52, %v107_v8 }
  0xb2   :  { %837 = vmatprep.subr.bf16.mxu0 %v1093_v55  ;;  %845 = vmatprep.subr.bf16.mxu1 %v1095_v56  ;;  %v135_v26 = vadd.f32 %v1049_v39, %v103_v14 }
  0xb3   :  { %839 = vmatpush1.bf16.msra.mxu0 %v1099_v61  ;;  %847 = vmatpush1.bf16.msra.mxu1 %v1101_v62  ;;  %v221_v34 = vadd.f32 %v205_v16, %v137_v19  ;;  %v223_v35 = vadd.f32 %v207_v25, %v139_v20 }
  0xb5   :  { %v150_v0 = vpop.permute.xlu1 %149 }
  0xb6   :  { %v200_v30 = vmul.f32 %v1057_v47, %v150_v0  ;;  %v201_v21 = vmul.f32 %v1059_v48, %v150_v0  ;;  %v202_v31 = vmul.f32 %v1061_v49, %v150_v0  ;;  %v203_v32 = vmul.f32 %v1063_v50, %v150_v0 }
  0xb7   :  { %v220_v49 = vadd.f32 %v204_v15, %v136_v18  ;;  %v222_v50 = vadd.f32 %v206_v11, %v138_v29 }
  0xb8   :  { %v216_v27 = vadd.f32 %v200_v30, %v132_v22  ;;  %v217_v36 = vadd.f32 %v201_v21, %v133_v23  ;;  %v218_v17 = vadd.f32 %v202_v31, %v134_v24  ;;  %v219_v37 = vadd.f32 %v203_v32, %v135_v26 }
  0xb9   :  { %v975_v31 = vmov 0   ;;  %v868_v32 = vpack.c.bf16 %v1012_v3, %v1008_v2  ;;  %v872_v24 = vpack.c.bf16 %v1016_v4, %v1020_v6 }
  0xba   :  { %v234_v46 = vpop.permute.xlu1 %233  ;;  %897 = vset.pattern.permute.xlu1 %v975_v31  ;;  %898 = vset.pattern.permute.xlu0 %v975_v31 }
  0xbb   :  { %v284_v28 = vmul.f32 %v1073_v57, %v234_v46  ;;  %v285_v33 = vmul.f32 %v1067_v53, %v234_v46  ;;  %v286_v47 = vmul.f32 %v1075_v58, %v234_v46  ;;  %v287_v48 = vmul.f32 %v1069_v54, %v234_v46 }
  0xbd   :  { %v301_v43 = vadd.f32 %v285_v33, %v217_v36  ;;  %v303_v44 = vadd.f32 %v287_v48, %v219_v37  ;;  %v300_v45 = vadd.f32 %v284_v28, %v216_v27  ;;  %v302_v51 = vadd.f32 %v286_v47, %v218_v17 }
  0xbe   :  { %v238_v38 = vpop.permute.xlu1 %237 }
  0xbf   :  { %v288_v40 = vmul.f32 %v1073_v57, %v238_v38  ;;  %v289_v39 = vmul.f32 %v1067_v53, %v238_v38  ;;  %v290_v41 = vmul.f32 %v1075_v58, %v238_v38  ;;  %v291_v42 = vmul.f32 %v1069_v54, %v238_v38  ;;  %v32_v53 = vld [vmem:[#allocation2 + $0x20] sm:$0xff]  ;;  %v816_v38 = vld [vmem:[#allocation2 + $0x28] ss:$0 sm:$0xff] }
  0xc1   :  { %v305_v52 = vadd.f32 %v289_v39, %v221_v34  ;;  %v307_v59 = vadd.f32 %v291_v42, %v223_v35  ;;  %v304_v60 = vadd.f32 %v288_v40, %v220_v49  ;;  %v306_v63 = vadd.f32 %v290_v41, %v222_v50 }
  0xc3   :  { %v840_v0 = vpack.c.bf16 %v305_v52, %v301_v43  ;;  %v848_v1 = vpack.c.bf16 %v307_v59, %v303_v44  ;;  %v842_v5 = vpack.c.bf16 %v304_v60, %v300_v45  ;;  %v850_v7 = vpack.c.bf16 %v306_v63, %v302_v51 }
  0xc4   :  { %v747_v60 = vand.u32 127, %v56_v9 }
  0xc5   :  { %841 = vmatprep.subr.bf16.mxu0 %v840_v0  ;;  %849 = vmatprep.subr.bf16.mxu1 %v848_v1 }
  0xc6   :  { %843 = vmatpush1.bf16.msra.mxu0 %v842_v5  ;;  %851 = vmatpush1.bf16.msra.mxu1 %v850_v7 }
  0xc7   :  { %853 = vmatprep.subr.bf16.mxu0 %v1093_v55  ;;  %861 = vmatprep.subr.bf16.mxu1 %v1095_v56 }
  0xc9   :  { %814 = vmatmul.mubr.msk.f32.vlgmr.msra.gmra.mrb[0].mxu0 %vm308_vm0, %v32_v53  ;;  %815 = vmatmul.mubr.msk.f32.vlgmr.msra.gmra.mrb[0].mxu1 %vm308_vm0, %v32_v53 }
  0xcf   :  { %855 = vmatpush1.bf16.xpose.msra.mxu0 %v1099_v61  ;;  %863 = vmatpush1.bf16.xpose.msra.mxu1 %v1101_v62 }
  0xd0   :  { %857 = vmatprep.subr.bf16.mxu0 %v840_v0  ;;  %865 = vmatprep.subr.bf16.mxu1 %v848_v1 }
  0xd7   :  { %859 = vmatpush1.bf16.xpose.msra.mxu0 %v842_v5  ;;  %867 = vmatpush1.bf16.xpose.msra.mxu1 %v850_v7 }
  0xd8   :  { %869 = vmatprep.subr.bf16.mxu0 %v868_v32 }
 0x19c   :  { %v378_v54 = vpop.f32.mrb[0].mxu0  ;;  %v449_v57 = vpop.f32.mrb[0].mxu1 }
 0x19d   :  { %v380_v58 = vpop.f32.mrb[1].mxu0  ;;  %v451_v8 = vpop.f32.mrb[1].mxu1 }
 0x19e   :  { %v457_v10 = vmax.f32 %v449_v57, %v451_v8  ;;  %v454_v55 = vmax.f32 %v378_v54, %v380_v58 }
 0x1a0   :  { %458 = vmax.xlane.f32.xlu1 %v457_v10  ;;  %455 = vmax.xlane.f32.xlu0 %v454_v55 }
 0x22d   :  { %v459_v56 = vpop.xlane.xlu1 %458  ;;  %v456_v12 = vpop.xlane.xlu0 %455 }
 0x22e   :  { %v462_v13 = vsub.f32 %v449_v57, %v459_v56  ;;  %v463_v14 = vsub.f32 %v451_v8, %v459_v56  ;;  %v460_v15 = vsub.f32 %v378_v54, %v456_v12  ;;  %v461_v61 = vsub.f32 %v380_v58, %v456_v12 }
 0x230   :  { %v468_v16 = vmul.f32 1.442695, %v462_v13  ;;  %v470_v62 = vmul.f32 1.442695, %v463_v14  ;;  %v464_v11 = vmul.f32 1.442695, %v460_v15 }
 0x231   :  { %v466_v25 = vmul.f32 1.442695, %v461_v61 }
 0x232   :  { %899 = vpow2.f32 %v468_v16 }
 0x233   :  { %901 = vpow2.f32 %v470_v62 }
 0x234   :  { %903 = vpow2.f32 %v464_v11 }
 0x235   :  { %905 = vpow2.f32 %v466_v25 }
 0x23c   :  { %v900_v18 = vpop.eup %899 }
 0x23d   :  { %v902_v19 = vpop.eup %901 }
 0x23e   :  { %v904_v29 = vpop.eup %903  ;;  %612 = vmatprep.mubr.f32.mxu1 %v902_v19  ;;  %v475_v20 = vadd.f32 %v902_v19, %v900_v18 }
 0x23f   :  { %v906_v30 = vpop.eup %905  ;;  %613 = vmatmul.mubr.f32.vlgmr.msra.gmra.mrb[2].mxu1 %v900_v18 }
 0x240   :  { %542 = vmatprep.mubr.f32.mxu0 %v906_v30  ;;  %v472_v21 = vadd.f32 %v906_v30, %v904_v29 }
 0x241   :  { %543 = vmatmul.mubr.f32.vlgmr.msra.gmra.mrb[2].mxu0 %v904_v29 }
 0x242   :  { %473 = vadd.xlane.f32.xlu0 %v472_v21  ;;  %871 = vmatpush3.bf16.msra.mxu0 %v868_v32 }
 0x243   :  { %873 = vmatprep.subr.bf16.mxu0 %v872_v24 }
 0x246   :  { %476 = vadd.xlane.f32.xlu0 %v475_v20  ;;  %875 = vmatpush3.bf16.msra.mxu0 %v872_v24 }
 0x2cf   :  { %v474_v46 = vpop.xlane.xlu0 %473 }
 0x2d0   :  { %907 = vrcp.f32 %v474_v46 }
 0x2d3   :  { %v477_v22 = vpop.xlane.xlu0 %476 }
 0x2d4   :  { %909 = vrcp.f32 %v477_v22 }
 0x2da   :  { %v908_v23 = vpop.eup %907 }
 0x2db   :  { %622 = vperm.xlu1 %897, %v908_v23  }
 0x2de   :  { %v910_v26 = vpop.eup %909 }
 0x2df   :  { %627 = vperm.xlu0 %898, %v910_v26  }
 0x312   :  { %v614_v28 = vpop.f32.mrb[2].mxu1 }
 0x313   :  { %v616_v33 = vpop.f32.mrb[3].mxu1 }
 0x314   :  { %v544_v47 = vpop.f32.mrb[2].mxu0 }
 0x315   :  { %v546_v48 = vpop.f32.mrb[3].mxu0 }
 0x35a   :  { %v623_v2 = vpop.permute.xlu1 %622 }
 0x35b   :  { %v630_v3 = vmul.f32 %v623_v2, %v544_v47 }
 0x35d   :  { %833 = vmatprep.mubr.msk.f32.mxu0 %vm308_vm0, %v630_v3  ;;  %v725_v49 = vmul.f32 %v630_v3, %v630_v3 }
 0x35e   :  { %v628_v34 = vpop.permute.xlu0 %627 }
 0x35f   :  { %v631_v50 = vmul.f32 %v628_v34, %v614_v28  ;;  %v727_v35 = vsel %vm308_vm0, %v725_v49, 0.0 }
 0x360   :  { %728 = vadd.xlane.f32.xlu1 %v727_v35 }
 0x361   :  { %834 = vmatmul.mubr.msk.f32.vlgmr.msra.gmra.mrb[4].mxu0 %vm308_vm0, %v631_v50  ;;  %v726_v4 = vmul.f32 %v631_v50, %v631_v50 }
 0x363   :  { %v730_v6 = vsel %vm308_vm0, %v726_v4, 0.0 }
 0x364   :  { %731 = vadd.xlane.f32.xlu0 %v730_v6 }
 0x3ed   :  { %v729_v36 = vpop.xlane.xlu1 %728 }
 0x3ee   :  { %v733_v37 = vadd.f32 1e-06, %v729_v36 }
 0x3f1   :  { %v732_v27 = vpop.xlane.xlu0 %731 }
 0x3f2   :  { %v734_v17 = vadd.f32 1e-06, %v732_v27 }
 0x3f4   :  { %911 = vrsqrt.f32 %v734_v17 }
 0x3f5   :  { %913 = vrsqrt.f32 %v733_v37 }
 0x3fe   :  { %v912_v42 = vpop.eup %911 }
 0x3ff   :  { %v914_v45 = vpop.eup %913 }
 0x434   :  { %v835_v40 = vpop.f32.mrb[4].mxu0 }
 0x435   :  { %v714_v39 = vadd.f32 %v835_v40, %v816_v38  ;;  %v708_v41 = vpop.f32.mrb[5].mxu0 }
 0x436   :  { %v709_v43 = vadd.f32 %v816_v38, %v708_v41 }
 0x437   :  { %v738_v44 = vmul.f32 %v912_v42, %v714_v39  ;;  %v718_v63 = vmul.f32 0.5, %v714_v39 }
 0x438   :  { %v737_v52 = vmul.f32 %v914_v45, %v709_v43  ;;  %v717_v0 = vmul.f32 0.5, %v709_v43 }
 0x439   :  { %v743_v51 = vsel %vm739_vm1, %v738_v44, -inf  ;;  %915 = vtanh.f32 %v718_v63 }
 0x43a   :  { %744 = vmax.xlane.f32.xlu1 %v743_v51  ;;  %v740_v59 = vsel %vm739_vm1, %v737_v52, -inf  ;;  %917 = vtanh.f32 %v717_v0 }
 0x43e   :  { %741 = vmax.xlane.f32.xlu1 %v740_v59 }
 0x443   :  { %v916_v1 = vpop.eup %915 }
 0x444   :  { %v722_v5 = vadd.f32 1.0, %v916_v1  ;;  %v918_v7 = vpop.eup %917 }
 0x445   :  { %v721_v53 = vadd.f32 1.0, %v918_v7 }
 0x446   :  { %v724_v54 = vmul.f32 0.5, %v722_v5 }
 0x447   :  { %v723_v8 = vmul.f32 0.5, %v721_v53 }
 0x44f   :  { %750 = vrot.lane.b32.xlu1 %v747_v60, %s976_s0 }
 0x4c7   :  { %v745_v57 = vpop.xlane.xlu1 %744 }
 0x4c8   :  { %v788_v58 = vsel %vm786_vm2, %v724_v54, %v745_v57  ;;  %vm749_vm3 = vcmp.ge.f32.partialorder %v738_v44, %v745_v57 }
 0x4cb   :  { %v742_v10 = vpop.xlane.xlu1 %741 }
 0x4cc   :  { %v787_v55 = vsel %vm786_vm2, %v723_v8, %v742_v10  ;;  %vm748_vm4 = vcmp.ge.f32.partialorder %v737_v52, %v742_v10 }
 0x4cf   :  { %v751_v9 = vpop.permute.xlu1 %750 }
 0x4d0   :  { %v752_v56 = vsel %vm748_vm4, %v751_v9, 1073741824  ;;  %v753_v12 = vsel %vm749_vm3, %v751_v9, 1073741824 }
 0x4d1   :  { %v754_v13 = vsel %vm739_vm1, %v752_v56, 2147483647  ;;  %v769_v14 = vsel %vm739_vm1, %v753_v12, 2147483647 }
 0x4d2   :  { %v771_v15 = vshra.s32 %v769_v14, 16  ;;  %v756_v61 = vshra.s32 %v754_v13, 16  ;;  %v755_v11 = vand.u32 65535, %v754_v13  ;;  %v770_v29 = vand.u32 65535, %v769_v14 }
 0x4d4   :  { %v773_v16 = vcvt.s32.f32 %v771_v15  ;;  %v758_v62 = vcvt.s32.f32 %v756_v61  ;;  %v757_v19 = vcvt.s32.f32 %v755_v11  ;;  %v772_v30 = vcvt.s32.f32 %v770_v29 }
 0x4d6   :  { %774 = vmin.xlane.f32.xlu1 %v773_v16  ;;  %759 = vmin.xlane.f32.xlu0 %v758_v62 }
 0x563   :  { %v775_v25 = vpop.xlane.xlu1 %774  ;;  %v760_v18 = vpop.xlane.xlu0 %759 }
 0x564   :  { %vm761_vm5 = vcmp.eq.f32.partialorder %v758_v62, %v760_v18  ;;  %vm776_vm6 = vcmp.eq.f32.partialorder %v773_v16, %v775_v25  ;;  %v766_v31 = vcvt.f32.s32 %v760_v18  ;;  %v781_v46 = vcvt.f32.s32 %v775_v25 }
 0x565   :  { %v762_v20 = vsel %vm761_vm5, %v757_v19, inf  ;;  %v777_v21 = vsel %vm776_vm6, %v772_v30, inf }
 0x566   :  { %763 = vmin.xlane.f32.xlu0 %v762_v20  ;;  %v767_v22 = vshll.u32 %v766_v31, 16  ;;  %v782_v28 = vshll.u32 %v781_v46, 16 }
 0x56a   :  { %778 = vmin.xlane.f32.xlu0 %v777_v21 }
 0x5f3   :  { %v764_v32 = vpop.xlane.xlu0 %763 }
 0x5f4   :  { %v765_v23 = vcvt.f32.s32 %v764_v32 }
 0x5f6   :  { %v768_v24 = vadd.s32 %v767_v22, %v765_v23 }
 0x5f7   :  { %v779_v26 = vpop.xlane.xlu0 %778 }
 0x5f8   :  { %v784_v33 = vcvt.s32.f32 %v768_v24  ;;  %v780_v47 = vcvt.f32.s32 %v779_v26 }
 0x5fa   :  { %v783_v48 = vadd.s32 %v782_v28, %v780_v47  ;;  %v790_v2 = vsel %vm789_vm7, %v787_v55, %v784_v33 }
 0x5fb   :  { %v793_v3 = vsel %vm792_vm8, %v790_v2, 0.0 }
 0x5fc   :  { %v785_v49 = vcvt.s32.f32 %v783_v48  ;;  %795 = vst [vmem:[#allocation5] sm:$0xff] %v793_v3 }
 0x5fe   :  { %v791_v34 = vsel %vm789_vm7, %v788_v58, %v785_v49 }
 0x5ff   :  { %v794_v50 = vsel %vm792_vm8, %v791_v34, 0.0 }
 0x600   :  { %796 = vst [vmem:[#allocation5 + $0x8] sm:$0xff] %v794_v50 }
 0x601   :  { %952 = shalt.err (!%p949_p12)
}
 0x602   :  { %s953_s3 = scalar_lea.hbm %s1177_s2, 256 }
 0x603   :  { %p954_p13 = scmp.ne.s32.totalorder %s1177_s2, %s953_s3  ;;  %p957_p0 = scmp.lt.u32.totalorder %s953_s3, %s1177_s2 }
 0x605   :  { %p959_p1 = pnand %p957_p0, %p954_p13 }
 0x607   :  { %962 = shalt.err (!%p959_p1)
}
 0x608   :  { %808 = dma.vmem_to_hbm [thread:$0]  %s803_s27, 256, %s1177_s2, [#allocation4], %s968_s19, %s968_s19, %s969_s20  }
 0x609   :  { %965 = dma.done.wait [#allocation4], 256  }
 0x60a   :  { %966 = vsyncadd [#allocation4], 4294967040 }
 0x60b   :  { %812 = vsyncpa [#allocation3], 1 }
 0x60c   :  { %813 = vsyncpa [#allocation4], 1 }

</bundles_post_ra>
